<compile_context>
chip_gen: v7x
topology: tpu7x:2x2x1
jax: 0.10.0
libtpu: 0.0.40
codegen_flags: <defaults>
</compile_context>

<pallas_src>
import functools

import jax
import jax.numpy as jnp
from jax.experimental import pallas as pl
from jax.experimental.pallas import tpu as pltpu


def _round_up(n, m):
    return (n + m - 1) // m * m


def moe_kernel(x_ref, gw_ref, gb_ref, w1_ref, b1_ref, w2_ref, b2_ref, out_ref,
               *, num_experts, d_model):
    x = x_ref[...]                                          # (TM, input_dim)

    # Gating network: softmax(x @ Wg + bg) over experts (tiny matmul, N=E).
    logits = (jnp.dot(x.astype(jnp.float32), gw_ref[...],
                      preferred_element_type=jnp.float32) + gb_ref[...])
    m = jnp.max(logits, axis=1, keepdims=True)
    p = jnp.exp(logits - m)
    gates = p * pl.reciprocal(jnp.sum(p, axis=1, keepdims=True), approx=True)

    # Layer 1, all experts fused along N: (TM, D_in) @ (D_in, E*dm), one
    # bias+ReLU elementwise pass over (TM, E*dm).
    x_c = x.astype(w1_ref.dtype)                            # bf16 for the MXU
    h1 = jnp.maximum(
        jnp.dot(x_c, w1_ref[...], preferred_element_type=jnp.float32)
        + b1_ref[...], 0.0)                                 # (TM, E*dm) f32

    # Fold gate weighting + expert reduction into the MXU:
    #   out = sum_e (g_e * h1_e) @ W2_e + gates @ b2
    # Scale each expert's 128-aligned h1 slice by its gate column, then run a
    # single concatenated-K matmul (K = E*dm); the reduction over experts
    # happens inside the MXU accumulator instead of per-expert VPU adds.
    dm = d_model
    h1s = jnp.concatenate(
        [h1[:, e * dm:(e + 1) * dm] * gates[:, e:e + 1]
         for e in range(num_experts)],
        axis=1).astype(w2_ref.dtype)                        # (TM, E*dm) bf16
    out = (jnp.dot(h1s, w2_ref[...], preferred_element_type=jnp.float32)
           + jnp.dot(gates, b2_ref[...], preferred_element_type=jnp.float32))
    out_ref[...] = out.astype(out_ref.dtype)


def moe_forward(x, gate_w, gate_b, w1, b1, w2, b2, *, weight_dtype=jnp.bfloat16):
    B, input_dim = x.shape
    E, _, d_model = w1.shape
    Edm = E * d_model

    # Flatten expert weights for the fused matmuls; stream them in bf16.
    w1f = jnp.transpose(w1, (1, 0, 2)).reshape(input_dim, Edm).astype(weight_dtype)
    b1f = b1.reshape(1, Edm).astype(jnp.float32)
    w2f = w2.reshape(Edm, d_model).astype(weight_dtype)
    b2f = b2.astype(jnp.float32)                            # (E, d_model)
    gate_w = gate_w.astype(jnp.float32)
    gate_b = gate_b.astype(jnp.float32)

    # Token tile: <=128 (>=2 grid steps for realistic B -> v7x megacore
    # balance, lower vreg pressure), sublane-aligned for small/ragged B.
    tm = min(128, _round_up(B, 8))
    b_pad = _round_up(B, tm)
    if b_pad != B:
        x = jnp.pad(x, ((0, b_pad - B), (0, 0)))
    grid = (b_pad // tm,)

    # VMEM budget derived from actual block / intermediate sizes (+ headroom),
    # instead of a flat 48 MiB; stays well below v7x's 64 MiB physical VMEM.
    f32 = 4
    wsz = jnp.dtype(weight_dtype).itemsize
    weight_bytes = ((input_dim * E + E) * f32                 # gate_w, gate_b
                    + input_dim * Edm * wsz + Edm * f32       # w1f, b1f
                    + Edm * d_model * wsz + E * d_model * f32)  # w2f, b2
    tile_bytes = (tm * input_dim + tm * d_model) * f32        # x tile + out tile
    interm_bytes = tm * Edm * (f32 + wsz) + tm * d_model * f32  # h1, h1s, out
    vmem_limit_bytes = int(2 * (weight_bytes + tile_bytes + interm_bytes)
                           + (8 << 20))

    kernel = functools.partial(moe_kernel, num_experts=E, d_model=d_model)
    out = pl.pallas_call(
        kernel,
        out_shape=jax.ShapeDtypeStruct((b_pad, d_model), x.dtype),
        grid_spec=pltpu.PrefetchScalarGridSpec(
            num_scalar_prefetch=0,
            grid=grid,
            in_specs=[
                pl.BlockSpec((tm, input_dim), lambda i: (i, 0)),     # x (tiled)
                pl.BlockSpec((input_dim, E), lambda i: (0, 0)),      # gate_w
                pl.BlockSpec((1, E), lambda i: (0, 0)),              # gate_b
                pl.BlockSpec((input_dim, Edm), lambda i: (0, 0)),    # w1 flat
                pl.BlockSpec((1, Edm), lambda i: (0, 0)),            # b1 flat
                pl.BlockSpec((Edm, d_model), lambda i: (0, 0)),      # w2 flat
                pl.BlockSpec((E, d_model), lambda i: (0, 0)),        # b2
            ],
            out_specs=pl.BlockSpec((tm, d_model), lambda i: (i, 0)),
        ),
        compiler_params=pltpu.CompilerParams(
            dimension_semantics=("parallel",),  # token tiles -> megacore on v7x
            vmem_limit_bytes=vmem_limit_bytes),
    )(x, gate_w, gate_b, w1f, b1f, w2f, b2f)
    return out[:B]


def moe_ref(x, gate_w, gate_b, w1, b1, w2, b2):
    probs = jax.nn.softmax(x @ gate_w + gate_b, axis=1)                  # (B, E)
    h1 = jnp.maximum(jnp.einsum('bi,eid->ebd', x, w1) + b1[:, None, :], 0.0)
    h2 = jnp.einsum('ebd,edf->ebf', h1, w2) + b2[:, None, :]
    return jnp.einsum('be,ebd->bd', probs, h2)


if __name__ == "__main__":
    B, input_dim, d_model, num_experts = 8, 64, 256, 4

    key = jax.random.PRNGKey(0)
    keys = jax.random.split(key, 8)
    scale = 0.05
    x = jax.random.normal(keys[0], (B, input_dim), jnp.float32)
    gate_w = scale * jax.random.normal(keys[1], (input_dim, num_experts), jnp.float32)
    gate_b = scale * jax.random.normal(keys[2], (1, num_experts), jnp.float32)
    w1 = scale * jax.random.normal(keys[3], (num_experts, input_dim, d_model), jnp.float32)
    b1 = scale * jax.random.normal(keys[4], (num_experts, d_model), jnp.float32)
    w2 = scale * jax.random.normal(keys[5], (num_experts, d_model, d_model), jnp.float32)
    b2 = scale * jax.random.normal(keys[6], (num_experts, d_model), jnp.float32)

    out = moe_forward(x, gate_w, gate_b, w1, b1, w2, b2)
    out = jax.block_until_ready(out)

    ref = moe_ref(x, gate_w, gate_b, w1, b1, w2, b2)
    assert out.shape == (B, d_model)
    # Tolerance relaxed vs. pure-f32: bf16 weight streaming + approx reciprocal.
    assert jnp.allclose(out, ref, atol=2e-2, rtol=2e-2), \
        f"max abs err {jnp.max(jnp.abs(out - ref))}"
    print("KERNEL_OK")
</pallas_src>

<mosaic_0001>
module attributes {stable_mosaic.version = 11 : i64} {
  func.func @moe_kernel(%arg0: i32, %arg1: memref<8x64xf32, #tpu.memory_space<vmem>>, %arg2: memref<64x4xf32, #tpu.memory_space<vmem>>, %arg3: memref<1x4xf32, #tpu.memory_space<vmem>>, %arg4: memref<64x1024xbf16, #tpu.memory_space<vmem>>, %arg5: memref<1x1024xf32, #tpu.memory_space<vmem>>, %arg6: memref<1024x256xbf16, #tpu.memory_space<vmem>>, %arg7: memref<4x256xf32, #tpu.memory_space<vmem>>, %arg8: memref<8x256xf32, #tpu.memory_space<vmem>>) attributes {dimension_semantics = [#tpu.dimension_semantics<parallel>], iteration_bounds = array<i64: 1>, scalar_prefetch = 0 : i64, scratch_operands = 0 : i64, tpu.core_type = #tpu.core_type<tc>, window_params = [{transform_indices = @transform_0, window_bounds = array<i64: 8, 64>}, {pipeline_mode = #tpu.pipeline_mode<synchronous>, transform_indices = @transform_1, window_bounds = array<i64: 64, 4>}, {pipeline_mode = #tpu.pipeline_mode<synchronous>, transform_indices = @transform_2, window_bounds = array<i64: 1, 4>}, {pipeline_mode = #tpu.pipeline_mode<synchronous>, transform_indices = @transform_3, window_bounds = array<i64: 64, 1024>}, {pipeline_mode = #tpu.pipeline_mode<synchronous>, transform_indices = @transform_4, window_bounds = array<i64: 1, 1024>}, {pipeline_mode = #tpu.pipeline_mode<synchronous>, transform_indices = @transform_5, window_bounds = array<i64: 1024, 256>}, {pipeline_mode = #tpu.pipeline_mode<synchronous>, transform_indices = @transform_6, window_bounds = array<i64: 4, 256>}, {transform_indices = @transform_7, window_bounds = array<i64: 8, 256>}]} {
    %c0 = arith.constant 0 : index
    %c0_0 = arith.constant 0 : index
    %0 = vector.load %arg1[%c0, %c0_0] : memref<8x64xf32, #tpu.memory_space<vmem>>, vector<8x64xf32>
    %c0_1 = arith.constant 0 : index
    %c0_2 = arith.constant 0 : index
    %1 = vector.load %arg2[%c0_1, %c0_2] : memref<64x4xf32, #tpu.memory_space<vmem>>, vector<64x4xf32>
    %cst = arith.constant dense<0.000000e+00> : vector<8x4xf32>
    %2 = tpu.matmul %0, %1, %cst {dimension_numbers = #tpu.dot_dimension_numbers<[1], [0], [0], [1], [0, 0, 1, 1], [], []>} : vector<8x64xf32>, vector<64x4xf32>, vector<8x4xf32> -> vector<8x4xf32>
    %c0_3 = arith.constant 0 : index
    %c0_4 = arith.constant 0 : index
    %3 = vector.load %arg3[%c0_3, %c0_4] : memref<1x4xf32, #tpu.memory_space<vmem>>, vector<1x4xf32>
    %4 = vector.broadcast %3 : vector<1x4xf32> to vector<8x4xf32>
    %5 = arith.addf %2, %4 : vector<8x4xf32>
    %cst_5 = arith.constant dense<0xFF800000> : vector<8xf32>
    %6 = vector.multi_reduction <maximumf>, %5, %cst_5 [1] : vector<8x4xf32> to vector<8xf32>
    %7 = vector.shape_cast %6 : vector<8xf32> to vector<8x1xf32>
    %8 = vector.broadcast %7 : vector<8x1xf32> to vector<8x4xf32>
    %9 = arith.subf %5, %8 : vector<8x4xf32>
    %10 = math.exp %9 : vector<8x4xf32>
    %cst_6 = arith.constant dense<0.000000e+00> : vector<8xf32>
    %11 = vector.multi_reduction <add>, %10, %cst_6 [1] : vector<8x4xf32> to vector<8xf32>
    %12 = vector.shape_cast %11 : vector<8xf32> to vector<8x1xf32>
    %13 = tpu.reciprocal %12 {approx = true} : vector<8x1xf32> -> vector<8x1xf32>
    %14 = vector.broadcast %13 : vector<8x1xf32> to vector<8x4xf32>
    %15 = arith.mulf %10, %14 : vector<8x4xf32>
    %16 = arith.truncf %0 : vector<8x64xf32> to vector<8x64xbf16>
    %c0_7 = arith.constant 0 : index
    %c0_8 = arith.constant 0 : index
    %17 = vector.load %arg4[%c0_7, %c0_8] : memref<64x1024xbf16, #tpu.memory_space<vmem>>, vector<64x1024xbf16>
    %cst_9 = arith.constant dense<0.000000e+00> : vector<8x1024xf32>
    %18 = tpu.matmul %16, %17, %cst_9 {dimension_numbers = #tpu.dot_dimension_numbers<[1], [0], [0], [1], [0, 0, 1, 1], [], []>} : vector<8x64xbf16>, vector<64x1024xbf16>, vector<8x1024xf32> -> vector<8x1024xf32>
    %c0_10 = arith.constant 0 : index
    %c0_11 = arith.constant 0 : index
    %19 = vector.load %arg5[%c0_10, %c0_11] : memref<1x1024xf32, #tpu.memory_space<vmem>>, vector<1x1024xf32>
    %20 = vector.broadcast %19 : vector<1x1024xf32> to vector<8x1024xf32>
    %21 = arith.addf %18, %20 : vector<8x1024xf32>
    %cst_12 = arith.constant 0.000000e+00 : f32
    %22 = vector.broadcast %cst_12 : f32 to vector<8x1024xf32>
    %23 = arith.maximumf %21, %22 : vector<8x1024xf32>
    %24 = vector.extract_strided_slice %23 {offsets = [0, 0], sizes = [8, 256], strides = [1, 1]} : vector<8x1024xf32> to vector<8x256xf32>
    %25 = vector.extract_strided_slice %15 {offsets = [0, 0], sizes = [8, 1], strides = [1, 1]} : vector<8x4xf32> to vector<8x1xf32>
    %26 = vector.broadcast %25 : vector<8x1xf32> to vector<8x256xf32>
    %27 = arith.mulf %24, %26 : vector<8x256xf32>
    %28 = vector.extract_strided_slice %23 {offsets = [0, 256], sizes = [8, 256], strides = [1, 1]} : vector<8x1024xf32> to vector<8x256xf32>
    %29 = vector.extract_strided_slice %15 {offsets = [0, 1], sizes = [8, 1], strides = [1, 1]} : vector<8x4xf32> to vector<8x1xf32>
    %30 = vector.broadcast %29 : vector<8x1xf32> to vector<8x256xf32>
    %31 = arith.mulf %28, %30 : vector<8x256xf32>
    %32 = vector.extract_strided_slice %23 {offsets = [0, 512], sizes = [8, 256], strides = [1, 1]} : vector<8x1024xf32> to vector<8x256xf32>
    %33 = vector.extract_strided_slice %15 {offsets = [0, 2], sizes = [8, 1], strides = [1, 1]} : vector<8x4xf32> to vector<8x1xf32>
    %34 = vector.broadcast %33 : vector<8x1xf32> to vector<8x256xf32>
    %35 = arith.mulf %32, %34 : vector<8x256xf32>
    %36 = vector.extract_strided_slice %23 {offsets = [0, 768], sizes = [8, 256], strides = [1, 1]} : vector<8x1024xf32> to vector<8x256xf32>
    %37 = vector.extract_strided_slice %15 {offsets = [0, 3], sizes = [8, 1], strides = [1, 1]} : vector<8x4xf32> to vector<8x1xf32>
    %38 = vector.broadcast %37 : vector<8x1xf32> to vector<8x256xf32>
    %39 = arith.mulf %36, %38 : vector<8x256xf32>
    %40 = tpu.concatenate %27, %31, %35, %39 in 1 : vector<8x256xf32>, vector<8x256xf32>, vector<8x256xf32>, vector<8x256xf32> -> vector<8x1024xf32>
    %41 = arith.truncf %40 : vector<8x1024xf32> to vector<8x1024xbf16>
    %c0_13 = arith.constant 0 : index
    %c0_14 = arith.constant 0 : index
    %42 = vector.load %arg6[%c0_13, %c0_14] : memref<1024x256xbf16, #tpu.memory_space<vmem>>, vector<1024x256xbf16>
    %cst_15 = arith.constant dense<0.000000e+00> : vector<8x256xf32>
    %43 = tpu.matmul %41, %42, %cst_15 {dimension_numbers = #tpu.dot_dimension_numbers<[1], [0], [0], [1], [0, 0, 1, 1], [], []>} : vector<8x1024xbf16>, vector<1024x256xbf16>, vector<8x256xf32> -> vector<8x256xf32>
    %c0_16 = arith.constant 0 : index
    %c0_17 = arith.constant 0 : index
    %44 = vector.load %arg7[%c0_16, %c0_17] : memref<4x256xf32, #tpu.memory_space<vmem>>, vector<4x256xf32>
    %cst_18 = arith.constant dense<0.000000e+00> : vector<8x256xf32>
    %45 = tpu.matmul %15, %44, %cst_18 {dimension_numbers = #tpu.dot_dimension_numbers<[1], [0], [0], [1], [0, 0, 1, 1], [], []>} : vector<8x4xf32>, vector<4x256xf32>, vector<8x256xf32> -> vector<8x256xf32>
    %46 = arith.addf %43, %45 : vector<8x256xf32>
    %c0_19 = arith.constant 0 : index
    %c0_20 = arith.constant 0 : index
    %47 = vector.load %arg8[%c0_19, %c0_20] : memref<8x256xf32, #tpu.memory_space<vmem>>, vector<8x256xf32>
    tpu.vector_store %arg8[%c0_19, %c0_20], %46 {strides = array<i32>} : memref<8x256xf32, #tpu.memory_space<vmem>>, vector<8x256xf32>,
    return
  }
  func.func @transform_0(%arg0: i32) -> (i32, i32) {
    %c0_i32 = arith.constant 0 : i32
    %c0_i32_0 = arith.constant 0 : i32
    return %arg0, %c0_i32 : i32, i32
  }
  func.func @transform_1(%arg0: i32) -> (i32, i32) {
    %c0_i32 = arith.constant 0 : i32
    %c0_i32_0 = arith.constant 0 : i32
    %c0_i32_1 = arith.constant 0 : i32
    return %c0_i32, %c0_i32_0 : i32, i32
  }
  func.func @transform_2(%arg0: i32) -> (i32, i32) {
    %c0_i32 = arith.constant 0 : i32
    %c0_i32_0 = arith.constant 0 : i32
    %c0_i32_1 = arith.constant 0 : i32
    return %c0_i32, %c0_i32_0 : i32, i32
  }
  func.func @transform_3(%arg0: i32) -> (i32, i32) {
    %c0_i32 = arith.constant 0 : i32
    %c0_i32_0 = arith.constant 0 : i32
    %c0_i32_1 = arith.constant 0 : i32
    return %c0_i32, %c0_i32_0 : i32, i32
  }
  func.func @transform_4(%arg0: i32) -> (i32, i32) {
    %c0_i32 = arith.constant 0 : i32
    %c0_i32_0 = arith.constant 0 : i32
    %c0_i32_1 = arith.constant 0 : i32
    return %c0_i32, %c0_i32_0 : i32, i32
  }
  func.func @transform_5(%arg0: i32) -> (i32, i32) {
    %c0_i32 = arith.constant 0 : i32
    %c0_i32_0 = arith.constant 0 : i32
    %c0_i32_1 = arith.constant 0 : i32
    return %c0_i32, %c0_i32_0 : i32, i32
  }
  func.func @transform_6(%arg0: i32) -> (i32, i32) {
    %c0_i32 = arith.constant 0 : i32
    %c0_i32_0 = arith.constant 0 : i32
    %c0_i32_1 = arith.constant 0 : i32
    return %c0_i32, %c0_i32_0 : i32, i32
  }
  func.func @transform_7(%arg0: i32) -> (i32, i32) {
    %c0_i32 = arith.constant 0 : i32
    %c0_i32_0 = arith.constant 0 : i32
    return %arg0, %c0_i32 : i32, i32
  }
}

</mosaic_0001>

<bundles_post_ra>
// kernel: tpu_custom_call.1
= control target key start
LH: loop header
LB: loop body
LE: loop exit
PB: predicated region body
PF: predicated region fallthrough
CT: control target
= control target key end

     0   :  { %12 = vsyncpa [#allocation3], 0  ;;  %s2343_s0 = inlined_call_operand.vmem [shape: f32[8,64], index: 0, kind: input, shape index: {}]   ;;  %s2344_s1 = inlined_call_operand.vmem [shape: f32[64,4], index: 1, kind: input, shape index: {}]   ;;  %s2345_s2 = inlined_call_operand.vmem [shape: f32[1,4], index: 2, kind: input, shape index: {}]   ;;  %s2346_s3 = inlined_call_operand.hbm [shape: bf16[64,1024], index: 3, kind: input, shape index: {}]   ;;  %s2347_s4 = inlined_call_operand.vmem [shape: f32[1,1024], index: 4, kind: input, shape index: {}]   ;;  %s2348_s5 = inlined_call_operand.hbm [shape: bf16[1024,256], index: 5, kind: input, shape index: {}]   ;;  %s2349_s6 = inlined_call_operand.vmem [shape: f32[4,256], index: 6, kind: input, shape index: {}]   ;;  %s2350_s7 = inlined_call_operand.hbm [shape: f32[8,256], index: 7, kind: output, shape index: {}]  }
   0x1   :  { %13 = vsyncpa [#allocation6], 0 }
   0x2   :  { %14 = vsyncpa [#allocation4], 0  ;;  %s2137_s24 = smov [#allocation2]   ;;  %s2065_s28 = scalar_lea.hbm %s2346_s3, 4096 }
   0x3   :  { %s26_s25 = sshll.u32 %s2137_s24, 4  ;;  %p2066_p0 = scmp.ne.s32.totalorder %s2346_s3, %s2065_s28  ;;  %s27_s25 = int_to_ptr.vmem [resolvable:$true] %s26_s25 }
   0x4   :  { %p2069_p1 = scmp.lt.u32.totalorder %s2065_s28, %s2346_s3 }
   0x6   :  { %p2071_p2 = pnand %p2069_p1, %p2066_p0 }
   0x8   :  { %2074 = shalt.err (!%p2071_p2)
}
   0x9   :  { %s2075_s10 = scalar_lea.vmem %s27_s25, 4096  ;;  %p2080_p4 = scmp.lt.s32.totalorder %s27_s25, %s27_s25 }
   0xa   :  { %p2076_p3 = scmp.ne.s32.totalorder %s27_s25, %s2075_s10  ;;  %p2081_p5 = scmp.lt.s32.totalorder %s2075_s10, %s2075_s10 }
   0xc   :  { %p2082_p6 = por %p2081_p5, %p2080_p4 }
   0xe   :  { %p2083_p7 = pnand %p2082_p6, %p2076_p3 }
  0x10   :  { %2086 = shalt.err (!%p2083_p7)
}
  0x11   :  { %s2138_s11 = smov 512   ;;  %s2139_s12 = smov 32  }
  0x12   :  { %32 = dma.hbm_to_vmem [thread:$0]  %s2346_s3, 4096, %s27_s25, [#allocation3], %s2138_s11, %s2138_s11, %s2139_s12  }
  0x13   :  { %s2140_s15 = smov [#allocation5]   ;;  %s2087_s19 = scalar_lea.hbm %s2348_s5, 16384 }
  0x14   :  { %s40_s16 = sshll.u32 %s2140_s15, 4  ;;  %p2088_p8 = scmp.ne.s32.totalorder %s2348_s5, %s2087_s19  ;;  %s41_s16 = int_to_ptr.vmem [resolvable:$true] %s40_s16 }
  0x15   :  { %p2091_p9 = scmp.lt.u32.totalorder %s2087_s19, %s2348_s5 }
  0x17   :  { %p2093_p10 = pnand %p2091_p9, %p2088_p8 }
  0x19   :  { %2096 = shalt.err (!%p2093_p10)
}
  0x1a   :  { %s2097_s24 = scalar_lea.vmem %s41_s16, 16384  ;;  %p2102_p12 = scmp.lt.s32.totalorder %s41_s16, %s41_s16 }
  0x1b   :  { %p2098_p11 = scmp.ne.s32.totalorder %s41_s16, %s2097_s24  ;;  %p2103_p13 = scmp.lt.s32.totalorder %s2097_s24, %s2097_s24 }
  0x1d   :  { %p2104_p0 = por %p2103_p13, %p2102_p12 }
  0x1f   :  { %p2105_p1 = pnand %p2104_p0, %p2098_p11 }
  0x21   :  { %2108 = shalt.err (!%p2105_p1)
}
  0x22   :  { %s2141_s3 = smov 128   ;;  %s2142_s25 = smov 8  }
  0x23   :  { %46 = dma.hbm_to_vmem [thread:$0]  %s2348_s5, 16384, %s41_s16, [#allocation6], %s2141_s3, %s2141_s3, %s2142_s25  }
  0x24   :  { %2131 = dma.done.wait [#allocation3], 4096  }
  0x25   :  { %2132 = vsyncadd [#allocation3], 4294963200 }
  0x26   :  { %2133 = dma.done.wait [#allocation6], 16384  }
  0x27   :  { %2134 = vsyncadd [#allocation6], 4294950912  ;;  %v2143_v0 = vmov 0.0|0.0   ;;  %vm2144_vm0 = vmmov 0   ;;  %v2145_v1 = vmov 0.0   ;;  %v57_v2 = vld [vmem:[%s2344_s1] sm:$0xff] }
  0x28   :  { %1829 = vmatprep.subr.bf16.mxu0 %v2143_v0  ;;  %1826 = vmatprep.mubr.msk.f32.mxu0 %vm2144_vm0, %v2145_v1  ;;  %v58_v3 = vld [vmem:[%s2344_s1 + $0x8] sm:$0xff]  ;;  %v59_v4 = vld [vmem:[%s2344_s1 + $0x10] sm:$0xff]  ;;  %v60_v6 = vld [vmem:[%s2344_s1 + $0x18] sm:$0xff]  ;;  %vm72_vm1 = vcmask 523264   ;;  %vm146_vm2 = vcmask 31744   ;;  %v2146_v27 = vmov 0  }
  0x29   :  { %v1830_v5 = vpack.c.bf16 %v58_v3, %v57_v2  ;;  %v61_v7 = vld [vmem:[%s2344_s1 + $0x20] sm:$0xff]  ;;  %v1833_v8 = vpack.c.bf16 %v60_v6, %v59_v4  ;;  %v62_v9 = vld [vmem:[%s2344_s1 + $0x28] sm:$0xff]  ;;  %v63_v10 = vld [vmem:[%s2344_s1 + $0x30] sm:$0xff]  ;;  %428 = vmatprep.mubr.bf16.mxu1 %v2146_v27  ;;  %1863 = vset.pattern.permute.xlu1 %v2146_v27  ;;  %vm734_vm3 = vcmask 1043456  }
  0x2a   :  { %v64_v11 = vld [vmem:[%s2344_s1 + $0x38] sm:$0xff]  ;;  %v1836_v12 = vpack.c.bf16 %v62_v9, %v61_v7  ;;  %v2243_v14 = vld [vmem:[%s2343_s0] sm:$0xff]  ;;  %v160_v30 = vld [vmem:[#allocation2 + $0x8] sm:$0xff] }
  0x2b   :  { %1831 = vmatpush3.bf16.msra.mxu0 %v1830_v5  ;;  %v1839_v13 = vpack.c.bf16 %v64_v11, %v63_v10  ;;  %v1632_v15 = vld [vmem:[%s2345_s2] ss:$0 sm:$0xff]  ;;  %v164_v31 = vld [vmem:[#allocation2 + $0x28] sm:$0xff]  ;;  %v161_v50 = vld [vmem:[#allocation2 + $0x10] sm:$0xff]  ;;  %v158_v60 = vpack.c.bf16 %v2243_v14, %v2243_v14 }
  0x2c   :  { %1832 = vmatprep.subr.bf16.mxu0 %v2143_v0  ;;  %v159_v20 = vld [vmem:[#allocation2] sm:$0xff]  ;;  %v1636_v32 = vcombine.low %v160_v30, %v164_v31  ;;  %v1637_v33 = vcombine.high %v160_v30, %v164_v31  ;;  %v168_v34 = vld [vmem:[#allocation2 + $0x48] sm:$0xff]  ;;  %v165_v51 = vld [vmem:[#allocation2 + $0x30] sm:$0xff] }
  0x2d   :  { %v163_v21 = vld [vmem:[#allocation2 + $0x20] sm:$0xff]  ;;  %v172_v35 = vld [vmem:[#allocation2 + $0x68] sm:$0xff]  ;;  %v162_v54 = vld [vmem:[#allocation2 + $0x18] sm:$0xff]  ;;  %v1639_v56 = vcombine.high %v161_v50, %v165_v51  ;;  %v1638_v62 = vcombine.low %v161_v50, %v165_v51 }
  0x2e   :  { %v167_v22 = vld [vmem:[#allocation2 + $0x40] sm:$0xff]  ;;  %v1635_v23 = vcombine.high %v159_v20, %v163_v21  ;;  %v1634_v24 = vcombine.low %v159_v20, %v163_v21  ;;  %v1645_v37 = vcombine.high %v168_v34, %v172_v35  ;;  %v176_v38 = vld [vmem:[#allocation2 + $0x88] sm:$0xff]  ;;  %v1644_v43 = vcombine.low %v168_v34, %v172_v35  ;;  %v166_v55 = vld [vmem:[#allocation2 + $0x38] sm:$0xff] }
  0x2f   :  { %1834 = vmatpush3.bf16.msra.mxu0 %v1833_v8  ;;  %v171_v25 = vld [vmem:[#allocation2 + $0x60] sm:$0xff]  ;;  %v180_v39 = vld [vmem:[#allocation2 + $0xa8] sm:$0xff]  ;;  %v169_v58 = vld [vmem:[#allocation2 + $0x50] sm:$0xff]  ;;  %v1641_v61 = vcombine.high %v162_v54, %v166_v55  ;;  %v1640_v5 = vcombine.low %v162_v54, %v166_v55 }
  0x30   :  { %1835 = vmatprep.subr.bf16.mxu0 %v2143_v0  ;;  %v175_v26 = vld [vmem:[#allocation2 + $0x80] sm:$0xff]  ;;  %v1643_v28 = vcombine.high %v167_v22, %v171_v25  ;;  %396 = vmatprep.subr.bf16.mxu1 %v1635_v23  ;;  %v1642_v36 = vcombine.low %v167_v22, %v171_v25  ;;  %v1653_v44 = vcombine.high %v176_v38, %v180_v39  ;;  %v184_v46 = vld [vmem:[#allocation2 + $0xc8] sm:$0xff]  ;;  %v173_v59 = vld [vmem:[#allocation2 + $0x70] sm:$0xff] }
  0x31   :  { %v179_v29 = vld [vmem:[#allocation2 + $0xa0] sm:$0xff]  ;;  %397 = vmatpush1.bf16.msra.mxu1 %v1634_v24  ;;  %v188_v47 = vld [vmem:[#allocation2 + $0xe8] sm:$0xff]  ;;  %v1652_v49 = vcombine.low %v176_v38, %v180_v39  ;;  %v170_v63 = vld [vmem:[#allocation2 + $0x58] sm:$0xff]  ;;  %v1647_v2 = vcombine.high %v169_v58, %v173_v59  ;;  %v1646_v7 = vcombine.low %v169_v58, %v173_v59 }
  0x32   :  { %398 = vmatprep.subr.bf16.mxu1 %v1643_v28  ;;  %v1651_v40 = vcombine.high %v175_v26, %v179_v29  ;;  %v183_v41 = vld [vmem:[#allocation2 + $0xc0] sm:$0xff]  ;;  %v1650_v45 = vcombine.low %v175_v26, %v179_v29  ;;  %v1661_v52 = vcombine.high %v184_v46, %v188_v47  ;;  %v1660_v57 = vcombine.low %v184_v46, %v188_v47  ;;  %v177_v3 = vld [vmem:[#allocation2 + $0x90] sm:$0xff]  ;;  %v178_v8 = vld [vmem:[#allocation2 + $0x98] sm:$0xff] }
  0x33   :  { %1837 = vmatpush3.bf16.msra.mxu0 %v1836_v12  ;;  %v187_v42 = vld [vmem:[#allocation2 + $0xe0] sm:$0xff]  ;;  %v181_v4 = vld [vmem:[#allocation2 + $0xb0] sm:$0xff]  ;;  %v182_v9 = vld [vmem:[#allocation2 + $0xb8] sm:$0xff] }
  0x34   :  { %1838 = vmatprep.subr.bf16.mxu0 %v2143_v0  ;;  %v1659_v48 = vcombine.high %v183_v41, %v187_v42  ;;  %v1658_v53 = vcombine.low %v183_v41, %v187_v42  ;;  %v174_v0 = vld [vmem:[#allocation2 + $0x78] sm:$0xff]  ;;  %v1655_v10 = vcombine.high %v177_v3, %v181_v4  ;;  %v185_v11 = vld [vmem:[#allocation2 + $0xd0] sm:$0xff]  ;;  %v1656_v20 = vcombine.low %v178_v8, %v182_v9  ;;  %v729_v29 = vld [vmem:[%s2349_s6] sm:$0xff] }
  0x35   :  { %399 = vmatpush1.bf16.msra.mxu1 %v1642_v36  ;;  %v1649_v6 = vcombine.high %v170_v63, %v174_v0  ;;  %v189_v12 = vld [vmem:[#allocation2 + $0xf0] sm:$0xff]  ;;  %v731_v30 = vcombine.high %v729_v29, %v729_v29  ;;  %v1871_v31 = vld [vmem:[#allocation5 + $0x4] ss:$8 sps:$4 sm:$0xff]   ;;  %v1887_v36 = vld [vmem:[#allocation5 + $0x220] ss:$8 sps:$4 sm:$0xff]  }
  0x36   :  { %400 = vmatprep.subr.bf16.mxu1 %v1651_v40  ;;  %v1662_v22 = vcombine.low %v185_v11, %v189_v12  ;;  %v1881_v34 = vld [vmem:[#allocation5 + $0x210] ss:$8 sps:$4 sm:$0xff]   ;;  %v1889_v35 = vld [vmem:[#allocation5 + $0x224] ss:$8 sps:$4 sm:$0xff]   ;;  %v1899_v40 = vld [vmem:[#allocation5 + $0x240] ss:$8 sps:$4 sm:$0xff]  }
  0x37   :  { %1840 = vmatpush3.bf16.msra.mxu0 %v1839_v13  ;;  %v1648_v13 = vcombine.low %v170_v63, %v174_v0  ;;  %v1893_v38 = vld [vmem:[#allocation5 + $0x230] ss:$8 sps:$4 sm:$0xff]   ;;  %v1901_v39 = vld [vmem:[#allocation5 + $0x244] ss:$8 sps:$4 sm:$0xff]   ;;  %v1907_v41 = vld [vmem:[#allocation5 + $0x254] ss:$8 sps:$4 sm:$0xff]  }
  0x38   :  { %437 = vmatprep.subr.bf16.mxu0 %v1637_v33  ;;  %v1883_v33 = vld [vmem:[#allocation5 + $0x214] ss:$8 sps:$4 sm:$0xff]   ;;  %v1905_v42 = vld [vmem:[#allocation5 + $0x250] ss:$8 sps:$4 sm:$0xff]   ;;  %v1925_v47 = vld [vmem:[#allocation5 + $0x284] ss:$8 sps:$4 sm:$0xff]  }
  0x39   :  { %401 = vmatpush1.bf16.msra.mxu1 %v1650_v45  ;;  %v1919_v45 = vld [vmem:[#allocation5 + $0x274] ss:$8 sps:$4 sm:$0xff]   ;;  %v1917_v46 = vld [vmem:[#allocation5 + $0x270] ss:$8 sps:$4 sm:$0xff]   ;;  %v1937_v51 = vld [vmem:[#allocation5 + $0x2a4] ss:$8 sps:$4 sm:$0xff]  }
  0x3a   :  { %1827 = vmatmul.mubr.msk.f32.vlgmr.msra.gmra.mrb[0].mxu0 %vm72_vm1, %v2243_v14  ;;  %402 = vmatprep.subr.bf16.mxu1 %v1659_v48  ;;  %v1657_v14 = vcombine.high %v178_v8, %v182_v9  ;;  %v1923_v48 = vld [vmem:[#allocation5 + $0x280] ss:$8 sps:$4 sm:$0xff]   ;;  %v1929_v50 = vld [vmem:[#allocation5 + $0x290] ss:$8 sps:$4 sm:$0xff]   ;;  %v1949_v55 = vld [vmem:[#allocation5 + $0x2c4] ss:$8 sps:$4 sm:$0xff]  }
  0x3b   :  { %469 = vmatprep.mubr.bf16.mxu0 %v2146_v27  ;;  %438 = vmatpush1.bf16.msra.mxu0 %v1636_v32  ;;  %v1877_v32 = vld [vmem:[#allocation5 + $0x204] ss:$8 sps:$4 sm:$0xff]   ;;  %v1941_v54 = vld [vmem:[#allocation5 + $0x2b0] ss:$8 sps:$4 sm:$0xff]  }
  0x3c   :  { %439 = vmatprep.subr.bf16.mxu0 %v1645_v37  ;;  %v1895_v37 = vld [vmem:[#allocation5 + $0x234] ss:$8 sps:$4 sm:$0xff]   ;;  %v1953_v58 = vld [vmem:[#allocation5 + $0x2d0] ss:$8 sps:$4 sm:$0xff]  }
  0x3d   :  { %403 = vmatpush1.bf16.msra.mxu1 %v1658_v53  ;;  %v1943_v53 = vld [vmem:[#allocation5 + $0x2b4] ss:$8 sps:$4 sm:$0xff]  }
  0x3e   :  { %478 = vmatprep.subr.bf16.mxu1 %v1639_v56  ;;  %v1947_v56 = vld [vmem:[#allocation5 + $0x2c0] ss:$8 sps:$4 sm:$0xff]  }
  0x3f   :  { %440 = vmatpush1.bf16.msra.mxu0 %v1644_v43  ;;  %v1913_v43 = vld [vmem:[#allocation5 + $0x264] ss:$8 sps:$4 sm:$0xff]  }
  0x40   :  { %441 = vmatprep.subr.bf16.mxu0 %v1653_v44  ;;  %1666 = vmatmul.mubr.msk.bf16.vlgmr.msra.gmra.mrb[0].mxu1 %vm72_vm1, %v158_v60  ;;  %v1911_v44 = vld [vmem:[#allocation5 + $0x260] ss:$8 sps:$4 sm:$0xff]  }
  0x41   :  { %479 = vmatpush1.bf16.msra.mxu1 %v1638_v62  ;;  %510 = vmatprep.mubr.bf16.mxu1 %v2146_v27 }
  0x42   :  { %480 = vmatprep.subr.bf16.mxu1 %v1647_v2 }
  0x43   :  { %442 = vmatpush1.bf16.msra.mxu0 %v1652_v49  ;;  %v1931_v49 = vld [vmem:[#allocation5 + $0x294] ss:$8 sps:$4 sm:$0xff]  }
  0x44   :  { %443 = vmatprep.subr.bf16.mxu0 %v1661_v52  ;;  %v1935_v52 = vld [vmem:[#allocation5 + $0x2a0] ss:$8 sps:$4 sm:$0xff]  }
  0x45   :  { %481 = vmatpush1.bf16.msra.mxu1 %v1646_v7 }
  0x46   :  { %482 = vmatprep.subr.bf16.mxu1 %v1655_v10 }
  0x47   :  { %444 = vmatpush1.bf16.msra.mxu0 %v1660_v57  ;;  %v1955_v57 = vld [vmem:[#allocation5 + $0x2d4] ss:$8 sps:$4 sm:$0xff]  }
  0x48   :  { %519 = vmatprep.subr.bf16.mxu0 %v1641_v61 }
  0x4a   :  { %1667 = vmatmul.mubr.msk.bf16.vlgmr.msra.gmra.mrb[4].mxu0 %vm72_vm1, %v158_v60 }
  0x4b   :  { %520 = vmatpush1.bf16.msra.mxu0 %v1640_v5  ;;  %551 = vmatprep.mubr.bf16.mxu0 %v2146_v27 }
  0x4c   :  { %521 = vmatprep.subr.bf16.mxu0 %v1649_v6 }
  0x4f   :  { %522 = vmatpush1.bf16.msra.mxu0 %v1648_v13  ;;  %v1961_v13 = vld [vmem:[#allocation5 + $0x2e4] ss:$8 sps:$4 sm:$0xff]  }
  0x50   :  { %523 = vmatprep.subr.bf16.mxu0 %v1657_v14  ;;  %v1959_v14 = vld [vmem:[#allocation5 + $0x2e0] ss:$8 sps:$4 sm:$0xff]  }
  0x53   :  { %524 = vmatpush1.bf16.msra.mxu0 %v1656_v20  ;;  %v2149_v20 = vmov 3  }
 0x10d   :  { %v142_v16 = vpop.f32.mrb[0].mxu0 }
 0x10e   :  { %v2250_v17 = vadd.f32 %v1632_v15, %v142_v16  ;;  %v1828_v18 = vpop.f32.mrb[1].mxu0  ;;  %v1654_v15 = vcombine.low %v177_v3, %v181_v4  ;;  %v186_v16 = vld [vmem:[#allocation2 + $0xd8] sm:$0xff] }
 0x10f   :  { %v190_v18 = vld [vmem:[#allocation2 + $0xf8] sm:$0xff] }
 0x110   :  { %v147_v19 = vsel %vm146_vm2, %v2250_v17, -inf  ;;  %v1665_v21 = vcombine.high %v186_v16, %v190_v18  ;;  %483 = vmatpush1.bf16.msra.mxu1 %v1654_v15  ;;  %v1664_v23 = vcombine.low %v186_v16, %v190_v18  ;;  %v1872_v15 = vld [vmem:[#allocation5 + $0x10] ss:$8 sps:$4 sm:$0xff]   ;;  %v1880_v16 = vld [vmem:[#allocation5 + $0x24] ss:$8 sps:$4 sm:$0xff]   ;;  %v2148_v18 = vmov 2  }
 0x111   :  { %148 = vmax.xlane.f32.xlu0 %v147_v19  ;;  %v1663_v19 = vcombine.high %v185_v11, %v189_v12  ;;  %v1869_v11 = vld [vmem:[#allocation5] ss:$8 sps:$4 sm:$0xff]   ;;  %v1874_v12 = vld [vmem:[#allocation5 + $0x14] ss:$8 sps:$4 sm:$0xff]  }
 0x112   :  { %525 = vmatprep.subr.bf16.mxu0 %v1665_v21 }
 0x113   :  { %484 = vmatprep.subr.bf16.mxu1 %v1663_v19  ;;  %526 = vmatpush1.bf16.msra.mxu0 %v1664_v23  ;;  %v2274_v59 = vpop.f32.mrb[0].mxu1  ;;  %v1967_v19 = vld [vmem:[#allocation5 + $0x2f4] ss:$8 sps:$4 sm:$0xff]   ;;  %v1878_v23 = vld [vmem:[#allocation5 + $0x20] ss:$8 sps:$4 sm:$0xff]  }
 0x114   :  { %485 = vmatpush1.bf16.msra.mxu1 %v1662_v22  ;;  %1532 = vmatprep.subr.bf16.mxu0 %v1877_v32  ;;  %v1965_v22 = vld [vmem:[#allocation5 + $0x2f0] ss:$8 sps:$4 sm:$0xff]   ;;  %v1904_v32 = vld [vmem:[#allocation5 + $0x64] ss:$8 sps:$4 sm:$0xff]  }
 0x115   :  { %1670 = vmatprep.subr.msk.mxu1 %vm734_vm3, %v731_v30  ;;  %v1892_v30 = vld [vmem:[#allocation5 + $0x44] ss:$8 sps:$4 sm:$0xff]  }
 0x116   :  { %1669 = vmatmul.mubr.msk.bf16.vlgmr.msra.gmra.mrb[8].mxu0 %vm72_vm1, %v158_v60 }
 0x117   :  { %1668 = vmatmul.mubr.msk.bf16.vlgmr.msra.gmra.mrb[4].mxu1 %vm72_vm1, %v158_v60  ;;  %v2276_v60 = vpop.f32.mrb[1].mxu1 }
 0x118   :  { %803 = vmatprep.mubr.f32.mxu1 %v2145_v1  ;;  %v2147_v1 = vmov 1   ;;  %1671 = vmatpush1.msk.msra.mxu1 %vm734_vm3, %v729_v29  ;;  %v434_v61 = vpop.f32.mrb[2].mxu1  ;;  %v1884_v29 = vld [vmem:[#allocation5 + $0x30] ss:$8 sps:$4 sm:$0xff]  }
 0x119   :  { %1865 = vset.pattern.permute.xlu0 %v2147_v1  ;;  %1450 = vmatprep.subr.bf16.mxu1 %v1871_v31  ;;  %v435_v63 = vpop.f32.mrb[3].mxu1  ;;  %v1890_v1 = vld [vmem:[#allocation5 + $0x40] ss:$8 sps:$4 sm:$0xff]   ;;  %v1898_v31 = vld [vmem:[#allocation5 + $0x54] ss:$8 sps:$4 sm:$0xff]  }
 0x11d   :  { %v2278_v62 = vpop.f32.mrb[4].mxu0 }
 0x11e   :  { %v2280_v0 = vpop.f32.mrb[5].mxu0 }
 0x11f   :  { %v475_v2 = vpop.f32.mrb[6].mxu0 }
 0x120   :  { %v476_v3 = vpop.f32.mrb[7].mxu0 }
 0x19e   :  { %v149_v24 = vpop.xlane.xlu0 %148 }
 0x19f   :  { %v150_v25 = vsub.f32 %v2250_v17, %v149_v24  ;;  %v1875_v17 = vld [vmem:[#allocation5 + $0x200] ss:$8 sps:$4 sm:$0xff]  }
 0x1a0   :  { %1533 = vmatpush1.bf16.msra.mxu0 %v1875_v17  ;;  %v1896_v17 = vld [vmem:[#allocation5 + $0x50] ss:$8 sps:$4 sm:$0xff]  }
 0x1a1   :  { %v151_v26 = vmul.f32 1.442695, %v150_v25  ;;  %1534 = vmatprep.subr.bf16.mxu0 %v1883_v33  ;;  %v1886_v25 = vld [vmem:[#allocation5 + $0x34] ss:$8 sps:$4 sm:$0xff]   ;;  %v1902_v33 = vld [vmem:[#allocation5 + $0x60] ss:$8 sps:$4 sm:$0xff]  }
 0x1a3   :  { %2061 = vpow2.f32 %v151_v26 }
 0x1a4   :  { %1535 = vmatpush1.bf16.msra.mxu0 %v1881_v34  ;;  %v1910_v34 = vld [vmem:[#allocation5 + $0x74] ss:$8 sps:$4 sm:$0xff]  }
 0x1a5   :  { %1536 = vmatprep.subr.bf16.mxu0 %v1889_v35  ;;  %v1908_v35 = vld [vmem:[#allocation5 + $0x70] ss:$8 sps:$4 sm:$0xff]  }
 0x1a8   :  { %1537 = vmatpush1.bf16.msra.mxu0 %v1887_v36  ;;  %v1916_v36 = vld [vmem:[#allocation5 + $0x84] ss:$8 sps:$4 sm:$0xff]  }
 0x1a9   :  { %1538 = vmatprep.subr.bf16.mxu0 %v1895_v37  ;;  %v1914_v37 = vld [vmem:[#allocation5 + $0x80] ss:$8 sps:$4 sm:$0xff]  }
 0x1ac   :  { %1539 = vmatpush1.bf16.msra.mxu0 %v1893_v38  ;;  %v1922_v38 = vld [vmem:[#allocation5 + $0x94] ss:$8 sps:$4 sm:$0xff]  }
 0x1ad   :  { %v2267_v27 = vpop.eup %2061  ;;  %1540 = vmatprep.subr.bf16.mxu0 %v1901_v39  ;;  %v1920_v39 = vld [vmem:[#allocation5 + $0x90] ss:$8 sps:$4 sm:$0xff]  }
 0x1ae   :  { %v153_v28 = vsel %vm146_vm2, %v2267_v27, 0.0 }
 0x1af   :  { %154 = vadd.xlane.f32.xlu0 %v153_v28 }
 0x1b0   :  { %1541 = vmatpush1.bf16.msra.mxu0 %v1899_v40  ;;  %v1928_v40 = vld [vmem:[#allocation5 + $0xa4] ss:$8 sps:$4 sm:$0xff]  }
 0x1b1   :  { %1542 = vmatprep.subr.bf16.mxu0 %v1907_v41  ;;  %v1926_v41 = vld [vmem:[#allocation5 + $0xa0] ss:$8 sps:$4 sm:$0xff]  }
 0x1b4   :  { %1543 = vmatpush1.bf16.msra.mxu0 %v1905_v42  ;;  %v1934_v42 = vld [vmem:[#allocation5 + $0xb4] ss:$8 sps:$4 sm:$0xff]  }
 0x1b5   :  { %1544 = vmatprep.subr.bf16.mxu0 %v1913_v43  ;;  %v1932_v43 = vld [vmem:[#allocation5 + $0xb0] ss:$8 sps:$4 sm:$0xff]  }
 0x1b8   :  { %1545 = vmatpush1.bf16.msra.mxu0 %v1911_v44  ;;  %v1940_v44 = vld [vmem:[#allocation5 + $0xc4] ss:$8 sps:$4 sm:$0xff]  }
 0x1b9   :  { %1546 = vmatprep.subr.bf16.mxu0 %v1919_v45  ;;  %v1938_v45 = vld [vmem:[#allocation5 + $0xc0] ss:$8 sps:$4 sm:$0xff]  }
 0x1bc   :  { %1547 = vmatpush1.bf16.msra.mxu0 %v1917_v46  ;;  %v1946_v46 = vld [vmem:[#allocation5 + $0xd4] ss:$8 sps:$4 sm:$0xff]  }
 0x1bd   :  { %1548 = vmatprep.subr.bf16.mxu0 %v1925_v47  ;;  %v1944_v47 = vld [vmem:[#allocation5 + $0xd0] ss:$8 sps:$4 sm:$0xff]  }
 0x1c0   :  { %1549 = vmatpush1.bf16.msra.mxu0 %v1923_v48  ;;  %v1952_v48 = vld [vmem:[#allocation5 + $0xe4] ss:$8 sps:$4 sm:$0xff]  }
 0x1c1   :  { %1550 = vmatprep.subr.bf16.mxu0 %v1931_v49  ;;  %v1950_v49 = vld [vmem:[#allocation5 + $0xe0] ss:$8 sps:$4 sm:$0xff]  }
 0x1c4   :  { %1551 = vmatpush1.bf16.msra.mxu0 %v1929_v50  ;;  %v1958_v50 = vld [vmem:[#allocation5 + $0xf4] ss:$8 sps:$4 sm:$0xff]  }
 0x1c5   :  { %1552 = vmatprep.subr.bf16.mxu0 %v1937_v51  ;;  %v1956_v51 = vld [vmem:[#allocation5 + $0xf0] ss:$8 sps:$4 sm:$0xff]  }
 0x1c8   :  { %1553 = vmatpush1.bf16.msra.mxu0 %v1935_v52  ;;  %v1964_v52 = vld [vmem:[#allocation5 + $0x104] ss:$8 sps:$4 sm:$0xff]  }
 0x1c9   :  { %1554 = vmatprep.subr.bf16.mxu0 %v1943_v53  ;;  %v193_v53 = vlaneseq }
 0x1cc   :  { %1555 = vmatpush1.bf16.msra.mxu0 %v1941_v54  ;;  %v2292_v54 = vshrl.u32 %v193_v53, 7  ;;  %v1995_v53 = vld [vmem:[#allocation5 + $0x340] ss:$8 sps:$4 sm:$0xff]  }
 0x1cd   :  { %1556 = vmatprep.subr.bf16.mxu0 %v1949_v55 }
 0x1ce   :  { %v207_v55 = vsub.s32 3, %v2292_v54  ;;  %v211_v63 = vsub.s32 4, %v2292_v54  ;;  %v215_v2 = vsub.s32 5, %v2292_v54 }
 0x1d0   :  { %1557 = vmatpush1.bf16.msra.mxu0 %v1947_v56  ;;  %v195_v56 = vsub.s32 0, %v2292_v54 }
 0x1d1   :  { %1558 = vmatprep.subr.bf16.mxu0 %v1955_v57  ;;  %v199_v57 = vsub.s32 1, %v2292_v54 }
 0x1d4   :  { %1559 = vmatpush1.bf16.msra.mxu0 %v1953_v58  ;;  %v2300_v58 = vld [vmem:[%s2347_s4] sm:$0xff]  ;;  %s2150_s4 = smov [#allocation7]  }
 0x1d5   :  { %1560 = vmatprep.subr.bf16.mxu0 %v1961_v13  ;;  %v208_v61 = vrot.slane %v2300_v58, %v207_v55  ;;  %v196_v3 = vrot.slane %v2300_v58, %v195_v56  ;;  %v2000_v55 = vld [vmem:[#allocation5 + $0x164] ss:$8 sps:$4 sm:$0xff]   ;;  %v2003_v56 = vld [vmem:[#allocation5 + $0x354] ss:$8 sps:$4 sm:$0xff]   ;;  %s1622_s24 = sshll.u32 %s2150_s4, 4  ;;  %s1623_s24 = int_to_ptr.vmem [resolvable:$true] %s1622_s24 }
 0x1d6   :  { %s2109_s3 = scalar_lea.vmem %s1623_s24, 256  ;;  %p2114_p3 = scmp.lt.s32.totalorder %s1623_s24, %s1623_s24 }
 0x1d7   :  { %p2110_p2 = scmp.ne.s32.totalorder %s1623_s24, %s2109_s3  ;;  %p2115_p4 = scmp.lt.s32.totalorder %s2109_s3, %s2109_s3 }
 0x1d8   :  { %1561 = vmatpush1.bf16.msra.mxu0 %v1959_v14 }
 0x1d9   :  { %1562 = vmatprep.subr.bf16.mxu0 %v1967_v19  ;;  %p2116_p5 = por %p2115_p4, %p2114_p3 }
 0x1db   :  { %p2117_p6 = pnand %p2116_p5, %p2110_p2 }
 0x1dc   :  { %1563 = vmatpush1.bf16.msra.mxu0 %v1965_v22 }
 0x1e9   :  { %v2288_v21 = vpop.f32.mrb[8].mxu0 }
 0x1ea   :  { %v2282_v4 = vpop.f32.mrb[4].mxu1  ;;  %v2290_v24 = vpop.f32.mrb[9].mxu0 }
 0x1eb   :  { %v2284_v5 = vpop.f32.mrb[5].mxu1  ;;  %v557_v26 = vpop.f32.mrb[10].mxu0 }
 0x1ec   :  { %v516_v6 = vpop.f32.mrb[6].mxu1  ;;  %v558_v28 = vpop.f32.mrb[11].mxu0 }
 0x1ed   :  { %v517_v7 = vpop.f32.mrb[7].mxu1  ;;  %v200_v6 = vrot.slane %v2300_v58, %v199_v57  ;;  %v1962_v28 = vld [vmem:[#allocation5 + $0x100] ss:$8 sps:$4 sm:$0xff]  }
 0x1ee   :  { %v474_v7 = vadd.f32 %v2280_v0, %v208_v61  ;;  %v1998_v57 = vld [vmem:[#allocation5 + $0x160] ss:$8 sps:$4 sm:$0xff]   ;;  %v2001_v61 = vld [vmem:[#allocation5 + $0x350] ss:$8 sps:$4 sm:$0xff]  }
 0x1f0   :  { %v563_v13 = vmax.f32 %v474_v7, 0.0  ;;  %v2012_v7 = vld [vmem:[#allocation5 + $0x184] ss:$8 sps:$4 sm:$0xff]  }
 0x23c   :  { %v155_v8 = vpop.xlane.xlu0 %154 }
 0x23d   :  { %2063 = vrcp.f32 %v155_v8  ;;  %v212_v8 = vrot.slane %v2300_v58, %v211_v63  ;;  %v2006_v63 = vld [vmem:[#allocation5 + $0x174] ss:$8 sps:$4 sm:$0xff]  }
 0x23f   :  { %v513_v14 = vadd.f32 %v2282_v4, %v212_v8  ;;  %v2015_v8 = vld [vmem:[#allocation5 + $0x374] ss:$8 sps:$4 sm:$0xff]  }
 0x247   :  { %v2064_v9 = vpop.eup %2063 }
 0x248   :  { %v157_v10 = vmul.f32 %v2064_v9, %v2267_v27  ;;  %v1973_v27 = vld [vmem:[#allocation5 + $0x304] ss:$8 sps:$4 sm:$0xff]   ;;  %v216_v9 = vrot.slane %v2300_v58, %v215_v2 }
 0x249   :  { %1573 = vmatprep.subr.bf16.mxu0 %v1973_v27  ;;  %v2009_v2 = vld [vmem:[#allocation5 + $0x364] ss:$8 sps:$4 sm:$0xff]  }
 0x24a   :  { %576 = vperm.xlu0 %1865, %v157_v10   ;;  %570 = vperm.xlu1 %1863, %v157_v10  }
 0x24b   :  { %1672 = vmatmul.mubr.msk.f32.vlgmr.msra.gmra.mrb[8].mxu1 %vm146_vm2, %v157_v10 }
 0x24c   :  { %1451 = vmatpush1.bf16.msra.mxu1 %v1869_v11  ;;  %v433_v11 = vadd.f32 %v2276_v60, %v200_v6  ;;  %v2007_v6 = vld [vmem:[#allocation5 + $0x360] ss:$8 sps:$4 sm:$0xff]  }
 0x24d   :  { %1452 = vmatprep.subr.bf16.mxu1 %v1874_v12  ;;  %v223_v12 = vsub.s32 7, %v2292_v54 }
 0x24e   :  { %1864 = vset.pattern.permute.xlu1 %v2148_v18  ;;  %1867 = vset.pattern.permute.xlu0 %v2149_v20  ;;  %v561_v18 = vmax.f32 %v433_v11, 0.0  ;;  %v2018_v11 = vld [vmem:[#allocation5 + $0x194] ss:$8 sps:$4 sm:$0xff]  }
 0x24f   :  { %582 = vperm.xlu1 %1864, %v157_v10   ;;  %v224_v19 = vrot.slane %v2300_v58, %v223_v12  ;;  %v2021_v12 = vld [vmem:[#allocation5 + $0x384] ss:$8 sps:$4 sm:$0xff]  }
 0x250   :  { %1453 = vmatpush1.bf16.msra.mxu1 %v1872_v15  ;;  %v515_v15 = vadd.f32 %v2284_v5, %v216_v9  ;;  %v2010_v9 = vld [vmem:[#allocation5 + $0x180] ss:$8 sps:$4 sm:$0xff]  }
 0x251   :  { %1454 = vmatprep.subr.bf16.mxu1 %v1880_v16  ;;  %v556_v4 = vadd.f32 %v2290_v24, %v224_v19  ;;  %v2025_v19 = vld [vmem:[#allocation5 + $0x390] ss:$8 sps:$4 sm:$0xff]  }
 0x252   :  { %v565_v60 = vmax.f32 %v515_v15, 0.0  ;;  %v2024_v15 = vld [vmem:[#allocation5 + $0x1a4] ss:$8 sps:$4 sm:$0xff]  }
 0x253   :  { %1866 = vset.pattern.permute.xlu1 %v2149_v20 }
 0x254   :  { %588 = vperm.xlu1 %1866, %v157_v10   ;;  %1455 = vmatpush1.bf16.msra.mxu1 %v1878_v23  ;;  %v431_v10 = vadd.f32 %v2274_v59, %v196_v3  ;;  %v2004_v3 = vld [vmem:[#allocation5 + $0x170] ss:$8 sps:$4 sm:$0xff]  }
 0x255   :  { %1456 = vmatprep.subr.bf16.mxu1 %v1886_v25  ;;  %v564_v25 = vmax.f32 %v513_v14, 0.0  ;;  %v2019_v14 = vld [vmem:[#allocation5 + $0x380] ss:$8 sps:$4 sm:$0xff]  }
 0x256   :  { %v560_v16 = vmax.f32 %v431_v10, 0.0  ;;  %v2013_v10 = vld [vmem:[#allocation5 + $0x370] ss:$8 sps:$4 sm:$0xff]  }
 0x258   :  { %1457 = vmatpush1.bf16.msra.mxu1 %v1884_v29  ;;  %v1970_v29 = vld [vmem:[#allocation5 + $0x114] ss:$8 sps:$4 sm:$0xff]  }
 0x259   :  { %1458 = vmatprep.subr.bf16.mxu1 %v1892_v30 }
 0x25c   :  { %1459 = vmatpush1.bf16.msra.mxu1 %v1890_v1 }
 0x25d   :  { %1460 = vmatprep.subr.bf16.mxu1 %v1898_v31 }
 0x260   :  { %1461 = vmatpush1.bf16.msra.mxu1 %v1896_v17  ;;  %v567_v17 = vmax.f32 %v556_v4, 0.0  ;;  %v2037_v4 = vld [vmem:[#allocation5 + $0x3b0] ss:$8 sps:$4 sm:$0xff]  }
 0x261   :  { %1462 = vmatprep.subr.bf16.mxu1 %v1904_v32  ;;  %v1968_v32 = vld [vmem:[#allocation5 + $0x110] ss:$8 sps:$4 sm:$0xff]  }
 0x264   :  { %1463 = vmatpush1.bf16.msra.mxu1 %v1902_v33 }
 0x265   :  { %1464 = vmatprep.subr.bf16.mxu1 %v1910_v34 }
 0x268   :  { %1465 = vmatpush1.bf16.msra.mxu1 %v1908_v35  ;;  %v1971_v35 = vld [vmem:[#allocation5 + $0x300] ss:$8 sps:$4 sm:$0xff]  }
 0x269   :  { %1466 = vmatprep.subr.bf16.mxu1 %v1916_v36  ;;  %v1976_v36 = vld [vmem:[#allocation5 + $0x124] ss:$8 sps:$4 sm:$0xff]  }
 0x26c   :  { %1467 = vmatpush1.bf16.msra.mxu1 %v1914_v37  ;;  %v1979_v37 = vld [vmem:[#allocation5 + $0x314] ss:$8 sps:$4 sm:$0xff]  }
 0x26d   :  { %1468 = vmatprep.subr.bf16.mxu1 %v1922_v38 }
 0x270   :  { %1469 = vmatpush1.bf16.msra.mxu1 %v1920_v39  ;;  %v1974_v39 = vld [vmem:[#allocation5 + $0x120] ss:$8 sps:$4 sm:$0xff]  }
 0x271   :  { %1470 = vmatprep.subr.bf16.mxu1 %v1928_v40  ;;  %v1977_v40 = vld [vmem:[#allocation5 + $0x310] ss:$8 sps:$4 sm:$0xff]  }
 0x274   :  { %1471 = vmatpush1.bf16.msra.mxu1 %v1926_v41  ;;  %v1982_v41 = vld [vmem:[#allocation5 + $0x134] ss:$8 sps:$4 sm:$0xff]  }
 0x275   :  { %1472 = vmatprep.subr.bf16.mxu1 %v1934_v42 }
 0x278   :  { %1473 = vmatpush1.bf16.msra.mxu1 %v1932_v43  ;;  %v1985_v43 = vld [vmem:[#allocation5 + $0x324] ss:$8 sps:$4 sm:$0xff]  }
 0x279   :  { %1474 = vmatprep.subr.bf16.mxu1 %v1940_v44  ;;  %v1980_v44 = vld [vmem:[#allocation5 + $0x130] ss:$8 sps:$4 sm:$0xff]  }
 0x27c   :  { %1475 = vmatpush1.bf16.msra.mxu1 %v1938_v45  ;;  %v1983_v45 = vld [vmem:[#allocation5 + $0x320] ss:$8 sps:$4 sm:$0xff]  }
 0x27d   :  { %1476 = vmatprep.subr.bf16.mxu1 %v1946_v46  ;;  %v1988_v46 = vld [vmem:[#allocation5 + $0x144] ss:$8 sps:$4 sm:$0xff]  }
 0x280   :  { %1477 = vmatpush1.bf16.msra.mxu1 %v1944_v47  ;;  %v1991_v47 = vld [vmem:[#allocation5 + $0x334] ss:$8 sps:$4 sm:$0xff]  }
 0x281   :  { %1478 = vmatprep.subr.bf16.mxu1 %v1952_v48  ;;  %v1986_v48 = vld [vmem:[#allocation5 + $0x140] ss:$8 sps:$4 sm:$0xff]  }
 0x284   :  { %1479 = vmatpush1.bf16.msra.mxu1 %v1950_v49  ;;  %v1989_v49 = vld [vmem:[#allocation5 + $0x330] ss:$8 sps:$4 sm:$0xff]  }
 0x285   :  { %1480 = vmatprep.subr.bf16.mxu1 %v1958_v50  ;;  %v1994_v50 = vld [vmem:[#allocation5 + $0x154] ss:$8 sps:$4 sm:$0xff]  }
 0x288   :  { %1481 = vmatpush1.bf16.msra.mxu1 %v1956_v51  ;;  %v1997_v51 = vld [vmem:[#allocation5 + $0x344] ss:$8 sps:$4 sm:$0xff]  }
 0x289   :  { %1491 = vmatprep.subr.bf16.mxu1 %v1964_v52  ;;  %v1992_v52 = vld [vmem:[#allocation5 + $0x150] ss:$8 sps:$4 sm:$0xff]  }
 0x2c9   :  { %v2316_v0 = vpop.permute.xlu0 %576  ;;  %v571_v20 = vpop.permute.xlu1 %570 }
 0x2ca   :  { %v580_v22 = vmul.f32 %v2316_v0, %v563_v13  ;;  %v573_v23 = vmul.f32 %v571_v20, %v560_v16  ;;  %v574_v59 = vmul.f32 %v571_v20, %v561_v18  ;;  %v2016_v13 = vld [vmem:[#allocation5 + $0x190] ss:$8 sps:$4 sm:$0xff]   ;;  %v2027_v16 = vld [vmem:[#allocation5 + $0x394] ss:$8 sps:$4 sm:$0xff]   ;;  %v2022_v18 = vld [vmem:[#allocation5 + $0x1a0] ss:$8 sps:$4 sm:$0xff]  }
 0x2cb   :  { %v2030_v20 = vld [vmem:[#allocation5 + $0x1b4] ss:$8 sps:$4 sm:$0xff]  }
 0x2cc   :  { %v593_v26 = vpack.c.bf16 %v573_v23, %v573_v23  ;;  %v594_v27 = vpack.c.bf16 %v574_v59, %v574_v59  ;;  %v596_v5 = vpack.c.bf16 %v580_v22, %v580_v22  ;;  %v2033_v22 = vld [vmem:[#allocation5 + $0x3a4] ss:$8 sps:$4 sm:$0xff]   ;;  %v2028_v23 = vld [vmem:[#allocation5 + $0x1b0] ss:$8 sps:$4 sm:$0xff]   ;;  %v203_v59 = vsub.s32 2, %v2292_v54 }
 0x2ce   :  { %v583_v30 = vpop.permute.xlu1 %582  ;;  %1482 = vmatprep.mubr.bf16.mxu1 %v594_v27  ;;  %v2034_v27 = vld [vmem:[#allocation5 + $0x1c0] ss:$8 sps:$4 sm:$0xff]  }
 0x2cf   :  { %v585_v1 = vmul.f32 %v583_v30, %v564_v25  ;;  %v586_v31 = vmul.f32 %v583_v30, %v565_v60  ;;  %1483 = vmatmul.mubr.bf16.vlgmr.msra.gmra.mrb[12].mxu1 %v593_v26  ;;  %v2031_v25 = vld [vmem:[#allocation5 + $0x3a0] ss:$8 sps:$4 sm:$0xff]   ;;  %v2036_v60 = vld [vmem:[#allocation5 + $0x1c4] ss:$8 sps:$4 sm:$0xff]   ;;  %v2039_v26 = vld [vmem:[#allocation5 + $0x3b4] ss:$8 sps:$4 sm:$0xff]  }
 0x2d0   :  { %1492 = vmatpush1.bf16.msra.mxu1 %v1962_v28  ;;  %1523 = vmatprep.mubr.bf16.mxu1 %v596_v5  ;;  %v204_v28 = vrot.slane %v2300_v58, %v203_v59  ;;  %v219_v5 = vsub.s32 6, %v2292_v54  ;;  %v2045_v30 = vld [vmem:[#allocation5 + $0x3c4] ss:$8 sps:$4 sm:$0xff]   ;;  %v2049_v54 = vld [vmem:[#allocation5 + $0x3d0] ss:$8 sps:$4 sm:$0xff]  }
 0x2d1   :  { %v597_v33 = vpack.c.bf16 %v585_v1, %v585_v1  ;;  %v598_v34 = vpack.c.bf16 %v586_v31, %v586_v31  ;;  %1493 = vmatprep.subr.bf16.mxu1 %v1970_v29  ;;  %v2042_v29 = vld [vmem:[#allocation5 + $0x1d4] ss:$8 sps:$4 sm:$0xff]   ;;  %v2040_v1 = vld [vmem:[#allocation5 + $0x1d0] ss:$8 sps:$4 sm:$0xff]  }
 0x2d2   :  { %v472_v31 = vadd.f32 %v2278_v62, %v204_v28  ;;  %v2052_v62 = vld [vmem:[#allocation5 + $0x1f0] ss:$8 sps:$4 sm:$0xff]  }
 0x2d3   :  { %1564 = vmatprep.mubr.bf16.mxu0 %v598_v34  ;;  %v2320_v38 = vpop.permute.xlu1 %588  ;;  %v2051_v34 = vld [vmem:[#allocation5 + $0x3d4] ss:$8 sps:$4 sm:$0xff]  }
 0x2d4   :  { %v592_v24 = vmul.f32 %v2320_v38, %v567_v17  ;;  %1494 = vmatpush1.bf16.msra.mxu1 %v1968_v32  ;;  %1565 = vmatmul.mubr.bf16.vlgmr.msra.gmra.mrb[12].mxu0 %v597_v33  ;;  %v2043_v17 = vld [vmem:[#allocation5 + $0x3c0] ss:$8 sps:$4 sm:$0xff]   ;;  %v2048_v32 = vld [vmem:[#allocation5 + $0x1e4] ss:$8 sps:$4 sm:$0xff]   ;;  %v220_v33 = vrot.slane %v2300_v58, %v219_v5 }
 0x2d5   :  { %1574 = vmatpush1.bf16.msra.mxu0 %v1971_v35  ;;  %1495 = vmatprep.subr.bf16.mxu1 %v1976_v36  ;;  %v2046_v35 = vld [vmem:[#allocation5 + $0x1e0] ss:$8 sps:$4 sm:$0xff]   ;;  %v562_v36 = vmax.f32 %v472_v31, 0.0 }
 0x2d6   :  { %v600_v42 = vpack.c.bf16 %v592_v24, %v592_v24  ;;  %1575 = vmatprep.subr.bf16.mxu0 %v1979_v37  ;;  %v2054_v37 = vld [vmem:[#allocation5 + $0x1f4] ss:$8 sps:$4 sm:$0xff]   ;;  %v554_v24 = vadd.f32 %v2288_v21, %v220_v33  ;;  %v2055_v58 = vld [vmem:[#allocation5 + $0x3e0] ss:$8 sps:$4 sm:$0xff]  }
 0x2d8   :  { %1496 = vmatpush1.bf16.msra.mxu1 %v1974_v39  ;;  %1605 = vmatprep.mubr.bf16.mxu0 %v600_v42  ;;  %v2057_v39 = vld [vmem:[#allocation5 + $0x3e4] ss:$8 sps:$4 sm:$0xff]   ;;  %v2060_v42 = vld [vmem:[#allocation5 + $0x3f4] ss:$8 sps:$4 sm:$0xff]  }
 0x2d9   :  { %1576 = vmatpush1.bf16.msra.mxu0 %v1977_v40  ;;  %1497 = vmatprep.subr.bf16.mxu1 %v1982_v41  ;;  %v579_v40 = vmul.f32 %v2316_v0, %v562_v36  ;;  %v566_v41 = vmax.f32 %v554_v24, 0.0 }
 0x2da   :  { %1577 = vmatprep.subr.bf16.mxu0 %v1985_v43 }
 0x2db   :  { %v595_v43 = vpack.c.bf16 %v579_v40, %v579_v40 }
 0x2dc   :  { %1498 = vmatpush1.bf16.msra.mxu1 %v1980_v44  ;;  %v2058_v44 = vld [vmem:[#allocation5 + $0x3f0] ss:$8 sps:$4 sm:$0xff]  }
 0x2dd   :  { %1578 = vmatpush1.bf16.msra.mxu0 %v1983_v45  ;;  %1499 = vmatprep.subr.bf16.mxu1 %v1988_v46  ;;  %v591_v45 = vmul.f32 %v2320_v38, %v566_v41 }
 0x2de   :  { %1579 = vmatprep.subr.bf16.mxu0 %v1991_v47 }
 0x2df   :  { %v599_v21 = vpack.c.bf16 %v591_v45, %v591_v45 }
 0x2e0   :  { %1500 = vmatpush1.bf16.msra.mxu1 %v1986_v48 }
 0x2e1   :  { %1580 = vmatpush1.bf16.msra.mxu0 %v1989_v49  ;;  %1501 = vmatprep.subr.bf16.mxu1 %v1994_v50 }
 0x2e2   :  { %1581 = vmatprep.subr.bf16.mxu0 %v1997_v51 }
 0x2e4   :  { %1502 = vmatpush1.bf16.msra.mxu1 %v1992_v52 }
 0x2e5   :  { %1582 = vmatpush1.bf16.msra.mxu0 %v1995_v53  ;;  %1503 = vmatprep.subr.bf16.mxu1 %v2000_v55 }
 0x2e6   :  { %1583 = vmatprep.subr.bf16.mxu0 %v2003_v56 }
 0x2e8   :  { %1504 = vmatpush1.bf16.msra.mxu1 %v1998_v57 }
 0x2e9   :  { %1584 = vmatpush1.bf16.msra.mxu0 %v2001_v61  ;;  %1505 = vmatprep.subr.bf16.mxu1 %v2006_v63 }
 0x2ea   :  { %1585 = vmatprep.subr.bf16.mxu0 %v2009_v2 }
 0x2ec   :  { %1506 = vmatpush1.bf16.msra.mxu1 %v2004_v3 }
 0x2ed   :  { %1586 = vmatpush1.bf16.msra.mxu0 %v2007_v6  ;;  %1507 = vmatprep.subr.bf16.mxu1 %v2012_v7 }
 0x2ee   :  { %1587 = vmatprep.subr.bf16.mxu0 %v2015_v8 }
 0x2f0   :  { %1508 = vmatpush1.bf16.msra.mxu1 %v2010_v9 }
 0x2f1   :  { %1588 = vmatpush1.bf16.msra.mxu0 %v2013_v10  ;;  %1509 = vmatprep.subr.bf16.mxu1 %v2018_v11 }
 0x2f2   :  { %1589 = vmatprep.subr.bf16.mxu0 %v2021_v12 }
 0x2f4   :  { %1510 = vmatpush1.bf16.msra.mxu1 %v2016_v13 }
 0x2f5   :  { %1590 = vmatpush1.bf16.msra.mxu0 %v2019_v14  ;;  %1511 = vmatprep.subr.bf16.mxu1 %v2024_v15 }
 0x2f6   :  { %1591 = vmatprep.subr.bf16.mxu0 %v2027_v16 }
 0x2f8   :  { %1512 = vmatpush1.bf16.msra.mxu1 %v2022_v18 }
 0x2f9   :  { %1592 = vmatpush1.bf16.msra.mxu0 %v2025_v19  ;;  %1513 = vmatprep.subr.bf16.mxu1 %v2030_v20 }
 0x2fa   :  { %1593 = vmatprep.subr.bf16.mxu0 %v2033_v22 }
 0x2fc   :  { %1514 = vmatpush1.bf16.msra.mxu1 %v2028_v23 }
 0x2fd   :  { %1594 = vmatpush1.bf16.msra.mxu0 %v2031_v25  ;;  %1515 = vmatprep.subr.bf16.mxu1 %v2036_v60 }
 0x2fe   :  { %1595 = vmatprep.subr.bf16.mxu0 %v2039_v26 }
 0x300   :  { %1516 = vmatpush1.bf16.msra.mxu1 %v2034_v27 }
 0x301   :  { %1596 = vmatpush1.bf16.msra.mxu0 %v2037_v4  ;;  %1517 = vmatprep.subr.bf16.mxu1 %v2042_v29 }
 0x302   :  { %1597 = vmatprep.subr.bf16.mxu0 %v2045_v30 }
 0x304   :  { %1518 = vmatpush1.bf16.msra.mxu1 %v2040_v1 }
 0x305   :  { %1598 = vmatpush1.bf16.msra.mxu0 %v2043_v17  ;;  %1519 = vmatprep.subr.bf16.mxu1 %v2048_v32 }
 0x306   :  { %1599 = vmatprep.subr.bf16.mxu0 %v2051_v34 }
 0x308   :  { %1520 = vmatpush1.bf16.msra.mxu1 %v2046_v35 }
 0x309   :  { %1600 = vmatpush1.bf16.msra.mxu0 %v2049_v54  ;;  %1521 = vmatprep.subr.bf16.mxu1 %v2054_v37 }
 0x30a   :  { %1601 = vmatprep.subr.bf16.mxu0 %v2057_v39 }
 0x30c   :  { %1522 = vmatpush1.bf16.msra.mxu1 %v2052_v62 }
 0x30d   :  { %1602 = vmatpush1.bf16.msra.mxu0 %v2055_v58 }
 0x30e   :  { %1603 = vmatprep.subr.bf16.mxu0 %v2060_v42 }
 0x30f   :  { %1524 = vmatmul.mubr.bf16.vlgmr.msra.gmra.mrb[16].mxu1 %v595_v43 }
 0x311   :  { %1604 = vmatpush1.bf16.msra.mxu0 %v2058_v44 }
 0x314   :  { %1606 = vmatmul.mubr.bf16.vlgmr.msra.gmra.mrb[12].mxu0 %v599_v21 }
 0x31e   :  { %v805_v46 = vpop.f32.mrb[8].mxu1 }
 0x31f   :  { %v807_v47 = vpop.f32.mrb[9].mxu1 }
 0x3a2   :  { %v1484_v0 = vpop.f32.mrb[12].mxu1 }
 0x3a3   :  { %v1485_v48 = vadd.f32 %v1484_v0, %v805_v46  ;;  %v1486_v49 = vpop.f32.mrb[13].mxu1 }
 0x3a4   :  { %v1487_v50 = vadd.f32 %v1486_v49, %v807_v47  ;;  %v1488_v51 = vpop.f32.mrb[14].mxu1 }
 0x3a5   :  { %v1489_v52 = vpop.f32.mrb[15].mxu1 }
 0x3e2   :  { %v1525_v53 = vpop.f32.mrb[16].mxu1 }
 0x3e3   :  { %v1526_v55 = vadd.f32 %v1525_v53, %v1485_v48  ;;  %v1527_v56 = vpop.f32.mrb[17].mxu1 }
 0x3e4   :  { %v1528_v57 = vadd.f32 %v1527_v56, %v1487_v50  ;;  %v1529_v61 = vpop.f32.mrb[18].mxu1 }
 0x3e5   :  { %v1530_v63 = vpop.f32.mrb[19].mxu1 }
 0x3e7   :  { %v1607_v38 = vpop.f32.mrb[12].mxu0 }
 0x3e8   :  { %v1842_v2 = vadd.f32 %v1607_v38, %v1526_v55  ;;  %v1609_v3 = vpop.f32.mrb[13].mxu0 }
 0x3e9   :  { %v1844_v6 = vadd.f32 %v1609_v3, %v1528_v57  ;;  %v1611_v7 = vpop.f32.mrb[14].mxu0 }
 0x3ea   :  { %1614 = vst [vmem:[#allocation7] sm:$0xff] %v1842_v2  ;;  %v1612_v8 = vpop.f32.mrb[15].mxu0 }
 0x3eb   :  { %1615 = vst [vmem:[#allocation7 + $0x8] sm:$0xff] %v1844_v6 }
 0x3ec   :  { %2120 = shalt.err (!%p2117_p6)
}
 0x3ed   :  { %s2121_s27 = scalar_lea.hbm %s2350_s7, 256 }
 0x3ee   :  { %p2122_p7 = scmp.ne.s32.totalorder %s2350_s7, %s2121_s27  ;;  %p2125_p8 = scmp.lt.u32.totalorder %s2121_s27, %s2350_s7 }
 0x3f0   :  { %p2127_p9 = pnand %p2125_p8, %p2122_p7 }
 0x3f2   :  { %2130 = shalt.err (!%p2127_p9)
}
 0x3f3   :  { %1625 = dma.vmem_to_hbm [thread:$0]  %s1623_s24, 256, %s2350_s7, [#allocation4]  }
 0x3f4   :  { %2135 = dma.done.wait [#allocation4], 256  }
 0x3f5   :  { %2136 = vsyncadd [#allocation4], 4294967040 }
 0x3f6   :  { %1629 = vsyncpa [#allocation3], 1 }
 0x3f7   :  { %1630 = vsyncpa [#allocation6], 1 }
 0x3f8   :  { %1631 = vsyncpa [#allocation4], 1 }

</bundles_post_ra>
